<compile_context>
chip_gen: v7x
topology: tpu7x:2x2x1
jax: 0.10.0
libtpu: 0.0.40
codegen_flags: <defaults>
</compile_context>

<pallas_src>
import jax
import jax.numpy as jnp
from jax import lax
from jax.experimental import pallas as pl
from jax.experimental.pallas import tpu as pltpu

POWER = 2  # Normalize(power=2); kernel math below assumes p == 2 (x*x, rsqrt).


def _normalize_kernel(x_ref, o_ref):
    # x_ref / o_ref: (C, TILE_HW) block in VMEM. Channels on sublanes, spatial
    # positions dense on lanes. Reduce over channels (axis 0), then rsqrt (EUP)
    # and a broadcast multiply (VPU) — no per-element divide.
    x = x_ref[...].astype(jnp.float32)
    s = jnp.sum(x * x, axis=0, keepdims=True)        # (1, TILE_HW)
    inv = lax.rsqrt(s)
    o_ref[...] = (x * inv).astype(o_ref.dtype)


def _pick_tile_hw(hw, c, dtype_bytes, target_block_bytes=1 << 20):
    """Lane-dense spatial tile: ~target bytes per block, multiple of 128."""
    t = target_block_bytes // max(1, c * dtype_bytes)
    t = max(128, (t // 128) * 128)
    if t >= hw:
        return hw  # full spatial extent is always a legal block shape
    return t       # multiple of 128; remainder handled by cdiv grid + masked edge


def normalize(x):
    """Forward pass of Normalize (p=2) for NCHW x: x / sqrt(sum_c x^2)."""
    N, C, H, W = x.shape
    HW = H * W
    x3d = x.reshape(N, C, HW)  # free contiguous view — no wrapper transposes
    dtype_bytes = jnp.dtype(x.dtype).itemsize
    tile_hw = _pick_tile_hw(HW, C, dtype_bytes)
    grid = (N, pl.cdiv(HW, tile_hw))

    cost = pl.CostEstimate(
        flops=3 * N * C * HW,
        transcendentals=N * HW,
        bytes_accessed=2 * N * C * HW * dtype_bytes,
    )

    out3d = pl.pallas_call(
        _normalize_kernel,
        out_shape=jax.ShapeDtypeStruct((N, C, HW), x.dtype),
        grid_spec=pltpu.PrefetchScalarGridSpec(
            num_scalar_prefetch=0,
            grid=grid,
            # N dim squeezed (None) so the kernel sees a clean 2D (C, TILE_HW) tile.
            in_specs=[pl.BlockSpec((None, C, tile_hw), lambda n, j: (n, 0, j))],
            out_specs=pl.BlockSpec((None, C, tile_hw), lambda n, j: (n, 0, j)),
        ),
        compiler_params=pltpu.CompilerParams(
            # Both grid axes are independent -> shard across TensorCores (v7x).
            dimension_semantics=("parallel", "parallel"),
        ),
        cost_estimate=cost,
    )(x3d)
    return out3d.reshape(N, C, H, W)


if __name__ == "__main__":
    key = jax.random.PRNGKey(0)
    x = jax.random.normal(key, (2, 4, 16, 16), dtype=jnp.float32)  # NCHW

    out = normalize(x)
    out = jax.block_until_ready(out)

    # Reference check (plain JAX, mirrors the PyTorch math; no epsilon, same as spec).
    ref = x / (jnp.sum(x ** POWER, axis=1, keepdims=True) ** (1.0 / POWER))
    assert out.shape == x.shape
    assert jnp.allclose(out, ref, atol=1e-5, rtol=1e-5)

    print("KERNEL_OK")
</pallas_src>

<mosaic_0001>
module attributes {stable_mosaic.version = 11 : i64} {
  func.func @_normalize_kernel(%arg0: i32, %arg1: i32, %arg2: memref<1x4x256xf32, #tpu.memory_space<vmem>>, %arg3: memref<1x4x256xf32, #tpu.memory_space<vmem>>) attributes {dimension_semantics = [#tpu.dimension_semantics<parallel>, #tpu.dimension_semantics<parallel>], iteration_bounds = array<i64: 2, 1>, scalar_prefetch = 0 : i64, scratch_operands = 0 : i64, tpu.core_type = #tpu.core_type<tc>, window_params = [{transform_indices = @transform_0, window_bounds = array<i64: 1, 4, 256>}, {transform_indices = @transform_1, window_bounds = array<i64: 1, 4, 256>}]} {
    %c0 = arith.constant 0 : index
    %c0_0 = arith.constant 0 : index
    %c0_1 = arith.constant 0 : index
    %0 = vector.load %arg2[%c0, %c0_0, %c0_1] : memref<1x4x256xf32, #tpu.memory_space<vmem>>, vector<1x4x256xf32>
    %1 = vector.shape_cast %0 : vector<1x4x256xf32> to vector<4x256xf32>
    %2 = arith.mulf %1, %1 : vector<4x256xf32>
    %cst = arith.constant dense<0.000000e+00> : vector<256xf32>
    %3 = vector.multi_reduction <add>, %2, %cst [0] : vector<4x256xf32> to vector<256xf32>
    %4 = vector.shape_cast %3 : vector<256xf32> to vector<1x256xf32>
    %5 = math.rsqrt %4 : vector<1x256xf32>
    %6 = vector.broadcast %5 : vector<1x256xf32> to vector<4x256xf32>
    %7 = arith.mulf %1, %6 : vector<4x256xf32>
    %c0_2 = arith.constant 0 : index
    %c0_3 = arith.constant 0 : index
    %c0_4 = arith.constant 0 : index
    %8 = vector.load %arg3[%c0_2, %c0_3, %c0_4] : memref<1x4x256xf32, #tpu.memory_space<vmem>>, vector<1x4x256xf32>
    %9 = vector.shape_cast %8 : vector<1x4x256xf32> to vector<4x256xf32>
    %10 = vector.shape_cast %7 : vector<4x256xf32> to vector<1x4x256xf32>
    tpu.vector_store %arg3[%c0_2, %c0_3, %c0_4], %10 {strides = array<i32>} : memref<1x4x256xf32, #tpu.memory_space<vmem>>, vector<1x4x256xf32>,
    return
  }
  func.func @transform_0(%arg0: i32, %arg1: i32) -> (i32, i32, i32) {
    %c0_i32 = arith.constant 0 : i32
    %c0_i32_0 = arith.constant 0 : i32
    return %arg0, %c0_i32, %arg1 : i32, i32, i32
  }
  func.func @transform_1(%arg0: i32, %arg1: i32) -> (i32, i32, i32) {
    %c0_i32 = arith.constant 0 : i32
    %c0_i32_0 = arith.constant 0 : i32
    return %arg0, %c0_i32, %arg1 : i32, i32, i32
  }
}

</mosaic_0001>

<bundles_post_ra>
// kernel: tpu_custom_call.1
= control target key start
LH: loop header
LB: loop body
LE: loop exit
PB: predicated region body
PF: predicated region fallthrough
CT: control target
= control target key end

     0   :  { %6 = vsyncpa [#allocation3], 0  ;;  %s663_s0 = inlined_call_operand.hbm [shape: f32[2,4,256], index: 0, kind: input, shape index: {}]   ;;  %s664_s1 = inlined_call_operand.hbm [shape: f32[2,4,256], index: 1, kind: output, shape index: {}]  }
   0x1   :  { %8 = vsyncpa [#allocation3 + $0x1], 0 }
   0x2   :  { %9 = vsyncpa [#allocation4], 0 }
   0x3   :  { %11 = vsyncpa [#allocation4 + $0x1], 0  ;;  %s491_s6 = smov 0   ;;  %s493_s7 = smov 0  }
   0x4   :  { %s495_s8 = smov 0   ;;  %s497_s9 = smov 0  }
   0x5   :  { %s499_s10 = smov 0   ;;  %s501_s11 = smov 0  }
   0x6 LB: > { %s282_s12 = sadd.s32 4294967295, %s477_s11   ;;  %s283_s13 = sadd.s32 4294967294, %s477_s11   ;;  %s477_s11 = sphi %s501_s11, %s17_s11   ;;  %s473_s10 = sphi %s499_s10, %s680_s10   ;;  %s469_s9 = sphi %s497_s9, %s679_s9   ;;  %s465_s8 = sphi %s495_s8, %s678_s8   ;;  %s461_s7 = sphi %s493_s7, %s677_s7   ;;  %s457_s6 = sphi %s491_s6, %s676_s6  }
   0x7   : > { %s29_s14 = sadd.s32 1, %s473_s10  ;;  %s38_s15 = sadd.s32 1, %s465_s8 }
   0x8   : > { %p31_p0 = scmp.ge.s32.totalorder %s29_s14, 2  ;;  %p45_p1 = scmp.ne.s32.totalorder %s465_s8, %s461_s7 }
   0x9   : > { %p46_p2 = scmp.eq.s32.totalorder %s477_s11, 0  ;;  %p51_p3 = scmp.ne.s32.totalorder %s461_s7, %s457_s6 }
   0xa   : > { %s682_s14 = smov (%p31_p0, %s29_s14), 0  ;;  %p52_p5 = scmp.eq.s32.totalorder %s282_s12, 0 }
   0xb   : > { %p532_p4 = por %p46_p2, %p45_p1  ;;  %s33_s17 = ssub.s32 %s473_s10, %s682_s14 }
   0xc   : > { %p77_p6 = scmp.eq.s32.totalorder %s282_s12, 1  ;;  %p36_p7 = scmp.eq.s32.totalorder %s33_s17, 0 }
   0xd   : > { %p538_p8 = por %p52_p5, %p51_p3  ;;  %p83_p10 = scmp.eq.s32.totalorder %s283_s13, 1 }
   0xe   : > { %p542_p9 = por %p77_p6, %p45_p1  ;;  %p311_p13 = scmp.lt.s32.totalorder %s477_s11, 2 }
   0xf   : > { %s547_s20 = scalar_select %p36_p7, %s465_s8, %s38_s15  }
  0x10   : > { %s668_s19 = scalar_select %p542_p9, 1, 0 }
  0x11   : > { %p549_p11 = por %p83_p10, %p51_p3  ;;  %s103_s22 = sand.u32 1, %s465_s8  }
  0x12   : > { %s286_s23 = sshll.u32 %s103_s22, 3  ;;  %s297_s24 = sshll.u32 %s473_s10, 7 }
  0x13   : > { %s669_s21 = scalar_select %p549_p11, 1, 0 }
  0x14   : > { %s560_s27 = scalar_lea.hbm %s663_s0, %s297_s24  ;;  %s107_s28 = scalar_lea.vmem [#allocation2], %s286_s23 }
  0x15   : > { %s117_s29 = sshll.u32 %s107_s28, 4  ;;  %p566_p0 = pnand %p311_p13, %p532_p4  ;;  %s562_s29 = int_to_ptr.vmem [resolvable:$true] %s117_s29 }
  0x16   : > { %s104_s2 = scalar_lea.sflag [#allocation3], %s103_s22  ;;  %s365_s3 = scalar_lea.hbm %s560_s27, 128 }
  0x17   : > { %p366_p3 = scmp.ne.s32.totalorder %s560_s27, %s365_s3  ;;  %p367_p5 = pneg %p566_p0 }
  0x18   : > { %s370_s12 = scalar_lea.hbm %s663_s0, 256  ;;  %p371_p4 = scmp.lt.u32.totalorder %s560_s27, %s663_s0 }
  0x19   : > { %p368_p6 = pnand %p367_p5, %p366_p3  ;;  %p372_p10 = scmp.lt.u32.totalorder %s370_s12, %s365_s3 }
  0x1a   : > { %p374_p12 = scmp.lt.u32.totalorder %s365_s3, %s560_s27 }
  0x1b   : > { %p369_p7 = pneg %p368_p6  ;;  %p373_p13 = por %p372_p10, %p371_p4 }
  0x1d   : > { %p375_p1 = por %p374_p12, %p373_p13 }
  0x1f   : > { %p376_p2 = pnand %p375_p1, %p369_p7 }
  0x21   : > { %379 = shalt.err (!%p376_p2)
}
  0x22   : > { %s380_s16 = scalar_lea.vmem %s562_s29, 128  ;;  %s479_s17 = smov [#allocation2]  }
  0x23   : > { %p381_p3 = scmp.ne.s32.totalorder %s562_s29, %s380_s16  ;;  %s385_s22 = sshll.u32 %s479_s17, 4  ;;  %s386_s22 = int_to_ptr.vmem [resolvable:$false] %s385_s22 }
  0x24   : > { %s387_s23 = scalar_lea.vmem %s386_s22, 256  ;;  %p388_p9 = scmp.lt.s32.totalorder %s562_s29, %s386_s22 }
  0x25   : > { %p383_p6 = pnand %p381_p3, %p367_p5  ;;  %p389_p4 = scmp.lt.s32.totalorder %s387_s23, %s380_s16 }
  0x27   : > { %p384_p11 = pneg %p383_p6  ;;  %p390_p10 = por %p389_p4, %p388_p9 }
  0x29   : > { %p391_p12 = pnand %p390_p10, %p384_p11 }
  0x2b   : > { %394 = shalt.err (!%p391_p12)
}
  0x2c   : > { %306 = dma.hbm_to_vmem [thread:$0]  (!%p566_p0), %s560_s27, 128, %s562_s29, %s104_s2  }
  0x2d   : > { %p671_p1 = scmp.lt.s32.totalorder %s477_s11, 3  ;;  %p672_p2 = scmp.ge.s32.totalorder %s477_s11, 1 }
  0x2f   : > { %p123_p5 = pnand %p672_p2, %p671_p1 }
  0x30   : > { %s602_s24 = sand.u32 (!%p123_p5), 1, %s461_s7  }
  0x31   : > { %126 = sbr.rel (%p123_p5) target bundleno = 104 (0x68), region = 24  ;;  %s290_s25 = sshll.u32 (!%p123_p5), %s602_s24, 3 }
  0x32   : > { %s129_s26 = scalar_lea.sflag (!%p123_p5), [#allocation3], %s602_s24  ;;  %s132_s28 = scalar_lea.vmem (!%p123_p5), [#allocation2], %s290_s25 }
  0x38   : > { %448 = dma.done.wait (%p538_p8), %s129_s26, 128  }
  0x39   : > { %450 = vsyncadd (%p538_p8), %s129_s26, 4294967168  ;;  %v153_v0 = vld [vmem:[%s132_s28] sm:$0xff]  ;;  %vm158_vm0 = vcmask 1043456   ;;  %s150_s18 = scalar_lea.vmem [#allocation5], %s290_s25  ;;  %s298_s29 = sshll.u32 %s469_s9, 7 }
  0x3a   : > { %v154_v1 = vmul.f32 %v153_v0, %v153_v0  ;;  %s198_s27 = sshll.u32 %s150_s18, 4  ;;  %s616_s3 = scalar_lea.hbm %s664_s1, %s298_s29  ;;  %s611_s27 = int_to_ptr.vmem [resolvable:$true] %s198_s27 }
  0x3b   : > { %s182_s4 = scalar_lea.sflag [#allocation4], %s602_s24  ;;  %s395_s5 = scalar_lea.vmem %s611_s27, 128 }
  0x3c   : > { %v156_v2 = vcombine.high %v154_v1, %v154_v1  ;;  %v159_v3 = vsel %vm158_vm0, %v154_v1, 0.0  ;;  %p396_p8 = scmp.ne.s32.totalorder %s611_s27, %s395_s5  ;;  %p673_p9 = scmp.ne.s32.totalorder %s668_s19, 0 }
  0x3d   : > { %v160_v4 = vrot.slane %v159_v3, 4  ;;  %s480_s9 = smov [#allocation5]  }
  0x3e   : > { %v166_v5 = vsel %vm158_vm0, %v156_v2, 0.0  ;;  %p397_p11 = pnand %p396_p8, %p673_p9  ;;  %s399_s12 = sshll.u32 %s480_s9, 4  ;;  %s400_s12 = int_to_ptr.vmem [resolvable:$false] %s399_s12 }
  0x3f   : > { %v161_v6 = vadd.f32 %v160_v4, %v159_v3  ;;  %v167_v7 = vrot.slane %v166_v5, 4  ;;  %s401_s13 = scalar_lea.vmem %s400_s12, 256  ;;  %p402_p7 = scmp.lt.s32.totalorder %s611_s27, %s400_s12 }
  0x40   : > { %p398_p0 = pneg %p397_p11  ;;  %p403_p13 = scmp.lt.s32.totalorder %s401_s13, %s395_s5 }
  0x41   : > { %v162_v8 = vrot.slane %v161_v6, 2  ;;  %v168_v9 = vadd.f32 %v167_v7, %v166_v5 }
  0x42   : > { %p404_p3 = por %p403_p13, %p402_p7 }
  0x43   : > { %v163_v10 = vadd.f32 %v162_v8, %v161_v6  ;;  %v169_v11 = vrot.slane %v168_v9, 2 }
  0x44   : > { %p405_p6 = pnand %p404_p3, %p398_p0 }
  0x45   : > { %v164_v12 = vrot.slane %v163_v10, 1  ;;  %v170_v13 = vadd.f32 %v169_v11, %v168_v9 }
  0x47   : > { %v165_v14 = vadd.f32 %v164_v12, %v163_v10  ;;  %v171_v15 = vrot.slane %v170_v13, 1 }
  0x49   : > { %v172_v16 = vadd.f32 %v171_v15, %v170_v13  ;;  %361 = vrsqrt.f32 %v165_v14 }
  0x4b   : > { %363 = vrsqrt.f32 %v172_v16 }
  0x53   : > { %v362_v17 = vpop.eup %361 }
  0x55   : > { %v364_v18 = vpop.eup %363 }
  0x56   : > { %v177_v19 = vcombine.low %v362_v17, %v364_v18 }
  0x58   : > { %v179_v20 = vmul.f32 %v177_v19, %v153_v0 }
  0x5a   : > { %180 = vst [vmem:[%s150_s18] sm:$0xff] %v179_v20 }
  0x5b   : > { %408 = shalt.err (!%p405_p6)
}
  0x5c   : > { %s409_s15 = scalar_lea.hbm %s616_s3, 128  ;;  %s413_s22 = scalar_lea.hbm %s664_s1, 256 }
  0x5d   : > { %p410_p4 = scmp.ne.s32.totalorder %s616_s3, %s409_s15  ;;  %p414_p1 = scmp.lt.u32.totalorder %s616_s3, %s664_s1 }
  0x5e   : > { %p415_p2 = scmp.lt.u32.totalorder %s413_s22, %s409_s15  ;;  %p417_p8 = scmp.lt.u32.totalorder %s409_s15, %s616_s3 }
  0x5f   : > { %p411_p10 = pnand %p410_p4, %p673_p9 }
  0x60   : > { %p416_p5 = por %p415_p2, %p414_p1 }
  0x61   : > { %p412_p12 = pneg %p411_p10 }
  0x62   : > { %p418_p11 = por %p417_p8, %p416_p5 }
  0x64   : > { %p419_p0 = pnand %p418_p11, %p412_p12 }
  0x66   : > { %422 = shalt.err (!%p419_p0)
}
  0x67   : > { %301 = dma.vmem_to_hbm [thread:$0]  (%p673_p9), %s611_s27, 128, %s616_s3, %s182_s4  }
  0x68 PF: > { %s210_s25 = sand.u32 1, %s457_s6   ;;  %p674_p7 = scmp.ne.s32.totalorder %s669_s21, 0 }
  0x69   : > { %p675_p13 = scmp.ge.s32.totalorder %s477_s11, 2  ;;  %s211_s26 = scalar_lea.sflag [#allocation4], %s210_s25 }
  0x6b   : > { %p308_p3 = pnand %p675_p13, %p674_p7 }
  0x6d   : > { %452 = dma.done.wait (!%p308_p3), %s211_s26, 128  }
  0x6e   : > { %454 = vsyncadd (!%p308_p3), %s211_s26, 4294967168  ;;  %s17_s11 = sadd.s32 1, %s477_s11   ;;  %s676_s6 = smov %s461_s7 }
  0x6f   : > { %p14_p6 = scmp.ge.s32.totalorder %s17_s11, 4   ;;  %s677_s7 = smov %s465_s8 }
  0x70   : > { %s678_s8 = smov %s547_s20  ;;  %s679_s9 = smov %s473_s10 }
  0x71   : > { %s680_s10 = smov %s682_s14  ;;  %16 = sbr.rel (!%p14_p6) target bundleno = 6 (0x6), region = 69 }
  0x78   :  { %216 = vsyncpa [#allocation3], 1 }
  0x79   :  { %218 = vsyncpa [#allocation3 + $0x1], 1 }
  0x7a   :  { %219 = vsyncpa [#allocation4], 1 }
  0x7b   :  { %221 = vsyncpa [#allocation4 + $0x1], 1 }

</bundles_post_ra>
